<compile_context>
chip_gen: v7x
topology: tpu7x:2x2x1
jax: 0.10.0
libtpu: 0.0.40
codegen_flags: <defaults>
</compile_context>

<pallas_src>
import numpy as np
import jax
import jax.numpy as jnp
from jax import lax
from jax.experimental import pallas as pl
from jax.experimental.pallas import tpu as pltpu

# TODO(synk): the torch module uses an unbounded `while True` power-iteration loop;
# here it is capped at MAX_ITERS (per-lane converged freeze + early exit once every
# pair has converged), identical to the reference as long as convergence is reached
# within the cap -- true for these strictly-positive matrices.
MAX_ITERS = 256


def _degree_prediction_kernel(a_ref, mask_ref, tfix_ref, o_ref):
    n = a_ref.shape[0]        # matrix dimension (rows == cols == num_nodes)
    p = a_ref.shape[2]        # padded pair count (multiple of 128)

    def matvec(v):
        # Av[i, pair] = sum_j A_pair[i, j] * v[j, pair]
        # a_ref[j] is the (row, pair) slab of column j -> pure (n, p) VPU FMAs.
        acc = a_ref[0] * v[0:1, :]
        for j in range(1, n):
            acc = acc + a_ref[j] * v[j:j + 1, :]
        return acc

    v0 = jnp.full((n, p), 1.0 / np.sqrt(n), dtype=jnp.float32)
    av0 = matvec(v0)
    ev0 = jnp.sum(v0 * av0, axis=0, keepdims=True)               # (1, p)
    done0 = jnp.zeros((1, p), dtype=jnp.float32)                 # 1.0 == converged

    def cond(state):
        it, _, _, _, done = state
        return jnp.logical_and(it < MAX_ITERS, jnp.min(done) < 0.5)

    def body(state):
        it, v, av, ev, done = state
        active = done < 0.5                                      # (1, p) bool
        v_new = av * lax.rsqrt(jnp.sum(av * av, axis=0, keepdims=True))
        av_new = matvec(v_new)                                   # one matvec / iter
        ev_new = jnp.sum(v_new * av_new, axis=0, keepdims=True)
        conv = jnp.abs(ev - ev_new) < 0.001
        v = jnp.where(active, v_new, v)
        av = jnp.where(active, av_new, av)
        ev = jnp.where(active, ev_new, ev)
        done = jnp.maximum(done, conv.astype(jnp.float32))
        return it + 1, v, av, ev, done

    _, v_fin, _, _, _ = lax.while_loop(
        cond, body, (jnp.zeros((), jnp.int32), v0, av0, ev0, done0))

    # compute_eigenvector_values: scale each pair's eigenvector by 1/v[src], then T_val.
    v_src = jnp.sum(v_fin * mask_ref[...], axis=0, keepdims=True)    # (1, p)
    inv_src = pl.reciprocal(v_src, approx=True)
    o_ref[...] = v_fin * inv_src * tfix_ref[...]


def degree_prediction_forward(weights_t, weights_r, x, r_zeros, r_const, t_paths):
    n = weights_t.shape[0]
    assert x.shape[0] == n, "len(x) must equal num_nodes"
    num_pairs = n * n
    p_pad = max(128, ((num_pairs + 127) // 128) * 128)
    pad = p_pad - num_pairs

    # Fuse the three (S,T,N,N) inputs once in XLA (single tensor -> single DMA).
    a_comb = (weights_r * r_zeros + r_const).astype(jnp.float32)        # [s,t,i,j]
    # Lane-batch the pairs: a_bat[j, i, p] = A_p[i, j], p = s*n + t.
    a_bat = jnp.transpose(a_comb, (3, 2, 0, 1)).reshape(n, n, num_pairs)
    if pad:
        # Pad with identity matrices: they converge on the first iteration and
        # keep every lane finite (their T_val is 0 so they contribute nothing).
        eye = jnp.broadcast_to(jnp.eye(n, dtype=jnp.float32)[:, :, None], (n, n, pad))
        a_bat = jnp.concatenate([a_bat, eye], axis=-1)

    # Per-pair source-row mask (src(p) = s = p // n; padded pairs point at row 0
    # so v_src stays non-zero and the zero T_val kills their contribution).
    pair_src = np.concatenate(
        [np.repeat(np.arange(n), n), np.zeros(pad, dtype=np.int64)]).astype(np.int32)
    src_mask = jnp.asarray(
        (np.arange(n)[:, None] == pair_src[None, :]).astype(np.float32))   # (n, p_pad)

    # weights_t_fixed[s, t] = weights_t[s, t] * t_paths[s, t], as a lane vector.
    t_fixed = (weights_t * t_paths).astype(jnp.float32).reshape(num_pairs)
    t_fixed = jnp.pad(t_fixed, (0, pad)).reshape(1, p_pad)

    out = pl.pallas_call(
        _degree_prediction_kernel,
        out_shape=jax.ShapeDtypeStruct((n, p_pad), jnp.float32),
        grid_spec=pltpu.PrefetchScalarGridSpec(
            num_scalar_prefetch=0,
            grid=(1,),
            in_specs=[
                pl.BlockSpec((n, n, p_pad), lambda i: (0, 0, 0)),   # A batched
                pl.BlockSpec((n, p_pad), lambda i: (0, 0)),          # src mask
                pl.BlockSpec((1, p_pad), lambda i: (0, 0)),          # T_val per pair
            ],
            out_specs=pl.BlockSpec((n, p_pad), lambda i: (0, 0)),
        ),
        compiler_params=pltpu.CompilerParams(
            dimension_semantics=("arbitrary",)),
    )(a_bat, src_mask, t_fixed)

    # Sum the per-pair scaled eigenvectors (padded lanes are exactly zero).
    return jnp.sum(out, axis=1)


def reference_forward_np(weights_t, weights_r, x, r_zeros, r_const, t_paths):
    """Faithful NumPy port of the torch forward (real while loop)."""
    wt = np.asarray(weights_t, np.float32)
    tp = np.asarray(t_paths, np.float32)
    wr = np.asarray(weights_r, np.float32)
    rz = np.asarray(r_zeros, np.float32)
    rc = np.asarray(r_const, np.float32)
    n = wt.shape[0]
    wt_fixed = wt * tp
    wr_comb = wr * rz + rc
    acc = np.zeros(n, dtype=np.float32)
    for s in range(n):
        for t in range(n):
            A = wr_comb[s, t]
            v = np.full((n, 1), 1.0 / np.sqrt(n), dtype=np.float32)
            ev = float(v[:, 0] @ (A @ v)[:, 0])
            while True:
                Av = A @ v
                v_new = Av / np.linalg.norm(Av)
                ev_new = float(v_new[:, 0] @ (A @ v_new)[:, 0])
                if abs(ev - ev_new) < 0.001:
                    break
                v, ev = v_new, ev_new
            vec = v_new[:, 0] * (1.0 / v_new[s, 0])
            acc = acc + vec * wt_fixed[s, t]
    return acc


if __name__ == "__main__":
    N = 8  # num_nodes (adj_mat is N x N)
    key = jax.random.PRNGKey(0)
    k1, k2, k3, k4, k5, k6 = jax.random.split(key, 6)

    # Parameters from __init__ (torch.rand -> uniform [0,1)), deterministic here.
    weights_t = jax.random.uniform(k1, (N, N), dtype=jnp.float32)
    weights_r = jax.random.uniform(k2, (N, N, N, N), dtype=jnp.float32)

    # Forward inputs: only len(x) is used by the module; r_* keep A strictly positive.
    x = jax.random.uniform(k3, (N, N), dtype=jnp.float32)
    r_zeros = (jax.random.uniform(k4, (N, N, N, N)) > 0.3).astype(jnp.float32)
    r_const = 0.1 * jax.random.uniform(k5, (N, N, N, N), dtype=jnp.float32) + 0.05
    t_paths = jax.random.uniform(k6, (N, N), dtype=jnp.float32)

    out = degree_prediction_forward(weights_t, weights_r, x, r_zeros, r_const, t_paths)
    out = jax.block_until_ready(out)

    ref = reference_forward_np(weights_t, weights_r, x, r_zeros, r_const, t_paths)
    out_np = np.asarray(out)
    assert np.all(np.isfinite(out_np))
    np.testing.assert_allclose(out_np, ref, rtol=5e-2, atol=5e-2)
    print("KERNEL_OK")
</pallas_src>

<mosaic_0001>
module attributes {stable_mosaic.version = 11 : i64} {
  func.func @_degree_prediction_kernel(%arg0: i32, %arg1: memref<8x8x128xf32, #tpu.memory_space<vmem>>, %arg2: memref<8x128xf32, #tpu.memory_space<vmem>>, %arg3: memref<1x128xf32, #tpu.memory_space<vmem>>, %arg4: memref<8x128xf32, #tpu.memory_space<vmem>>) attributes {dimension_semantics = [#tpu.dimension_semantics<arbitrary>], iteration_bounds = array<i64: 1>, scalar_prefetch = 0 : i64, scratch_operands = 0 : i64, tpu.core_type = #tpu.core_type<tc>, window_params = [{pipeline_mode = #tpu.pipeline_mode<synchronous>, transform_indices = @transform_0, window_bounds = array<i64: 8, 8, 128>}, {pipeline_mode = #tpu.pipeline_mode<synchronous>, transform_indices = @transform_1, window_bounds = array<i64: 8, 128>}, {pipeline_mode = #tpu.pipeline_mode<synchronous>, transform_indices = @transform_2, window_bounds = array<i64: 1, 128>}, {pipeline_mode = #tpu.pipeline_mode<synchronous>, transform_indices = @transform_3, window_bounds = array<i64: 8, 128>}]} {
    %cst = arith.constant 0.353553385 : f32
    %0 = vector.broadcast %cst : f32 to vector<8x128xf32>
    %c0 = arith.constant 0 : index
    %c0_0 = arith.constant 0 : index
    %c0_1 = arith.constant 0 : index
    %1 = vector.load %arg1[%c0, %c0_0, %c0_1] : memref<8x8x128xf32, #tpu.memory_space<vmem>>, vector<1x8x128xf32>
    %2 = vector.shape_cast %1 : vector<1x8x128xf32> to vector<8x128xf32>
    %3 = vector.extract_strided_slice %0 {offsets = [0, 0], sizes = [1, 128], strides = [1, 1]} : vector<8x128xf32> to vector<1x128xf32>
    %4 = vector.broadcast %3 : vector<1x128xf32> to vector<8x128xf32>
    %5 = arith.mulf %2, %4 : vector<8x128xf32>
    %c1 = arith.constant 1 : index
    %c0_2 = arith.constant 0 : index
    %c0_3 = arith.constant 0 : index
    %6 = vector.load %arg1[%c1, %c0_2, %c0_3] : memref<8x8x128xf32, #tpu.memory_space<vmem>>, vector<1x8x128xf32>
    %7 = vector.shape_cast %6 : vector<1x8x128xf32> to vector<8x128xf32>
    %8 = vector.extract_strided_slice %0 {offsets = [1, 0], sizes = [1, 128], strides = [1, 1]} : vector<8x128xf32> to vector<1x128xf32>
    %9 = vector.broadcast %8 : vector<1x128xf32> to vector<8x128xf32>
    %10 = arith.mulf %7, %9 : vector<8x128xf32>
    %11 = arith.addf %5, %10 : vector<8x128xf32>
    %c2 = arith.constant 2 : index
    %c0_4 = arith.constant 0 : index
    %c0_5 = arith.constant 0 : index
    %12 = vector.load %arg1[%c2, %c0_4, %c0_5] : memref<8x8x128xf32, #tpu.memory_space<vmem>>, vector<1x8x128xf32>
    %13 = vector.shape_cast %12 : vector<1x8x128xf32> to vector<8x128xf32>
    %14 = vector.extract_strided_slice %0 {offsets = [2, 0], sizes = [1, 128], strides = [1, 1]} : vector<8x128xf32> to vector<1x128xf32>
    %15 = vector.broadcast %14 : vector<1x128xf32> to vector<8x128xf32>
    %16 = arith.mulf %13, %15 : vector<8x128xf32>
    %17 = arith.addf %11, %16 : vector<8x128xf32>
    %c3 = arith.constant 3 : index
    %c0_6 = arith.constant 0 : index
    %c0_7 = arith.constant 0 : index
    %18 = vector.load %arg1[%c3, %c0_6, %c0_7] : memref<8x8x128xf32, #tpu.memory_space<vmem>>, vector<1x8x128xf32>
    %19 = vector.shape_cast %18 : vector<1x8x128xf32> to vector<8x128xf32>
    %20 = vector.extract_strided_slice %0 {offsets = [3, 0], sizes = [1, 128], strides = [1, 1]} : vector<8x128xf32> to vector<1x128xf32>
    %21 = vector.broadcast %20 : vector<1x128xf32> to vector<8x128xf32>
    %22 = arith.mulf %19, %21 : vector<8x128xf32>
    %23 = arith.addf %17, %22 : vector<8x128xf32>
    %c4 = arith.constant 4 : index
    %c0_8 = arith.constant 0 : index
    %c0_9 = arith.constant 0 : index
    %24 = vector.load %arg1[%c4, %c0_8, %c0_9] : memref<8x8x128xf32, #tpu.memory_space<vmem>>, vector<1x8x128xf32>
    %25 = vector.shape_cast %24 : vector<1x8x128xf32> to vector<8x128xf32>
    %26 = vector.extract_strided_slice %0 {offsets = [4, 0], sizes = [1, 128], strides = [1, 1]} : vector<8x128xf32> to vector<1x128xf32>
    %27 = vector.broadcast %26 : vector<1x128xf32> to vector<8x128xf32>
    %28 = arith.mulf %25, %27 : vector<8x128xf32>
    %29 = arith.addf %23, %28 : vector<8x128xf32>
    %c5 = arith.constant 5 : index
    %c0_10 = arith.constant 0 : index
    %c0_11 = arith.constant 0 : index
    %30 = vector.load %arg1[%c5, %c0_10, %c0_11] : memref<8x8x128xf32, #tpu.memory_space<vmem>>, vector<1x8x128xf32>
    %31 = vector.shape_cast %30 : vector<1x8x128xf32> to vector<8x128xf32>
    %32 = vector.extract_strided_slice %0 {offsets = [5, 0], sizes = [1, 128], strides = [1, 1]} : vector<8x128xf32> to vector<1x128xf32>
    %33 = vector.broadcast %32 : vector<1x128xf32> to vector<8x128xf32>
    %34 = arith.mulf %31, %33 : vector<8x128xf32>
    %35 = arith.addf %29, %34 : vector<8x128xf32>
    %c6 = arith.constant 6 : index
    %c0_12 = arith.constant 0 : index
    %c0_13 = arith.constant 0 : index
    %36 = vector.load %arg1[%c6, %c0_12, %c0_13] : memref<8x8x128xf32, #tpu.memory_space<vmem>>, vector<1x8x128xf32>
    %37 = vector.shape_cast %36 : vector<1x8x128xf32> to vector<8x128xf32>
    %38 = vector.extract_strided_slice %0 {offsets = [6, 0], sizes = [1, 128], strides = [1, 1]} : vector<8x128xf32> to vector<1x128xf32>
    %39 = vector.broadcast %38 : vector<1x128xf32> to vector<8x128xf32>
    %40 = arith.mulf %37, %39 : vector<8x128xf32>
    %41 = arith.addf %35, %40 : vector<8x128xf32>
    %c7 = arith.constant 7 : index
    %c0_14 = arith.constant 0 : index
    %c0_15 = arith.constant 0 : index
    %42 = vector.load %arg1[%c7, %c0_14, %c0_15] : memref<8x8x128xf32, #tpu.memory_space<vmem>>, vector<1x8x128xf32>
    %43 = vector.shape_cast %42 : vector<1x8x128xf32> to vector<8x128xf32>
    %44 = vector.extract_strided_slice %0 {offsets = [7, 0], sizes = [1, 128], strides = [1, 1]} : vector<8x128xf32> to vector<1x128xf32>
    %45 = vector.broadcast %44 : vector<1x128xf32> to vector<8x128xf32>
    %46 = arith.mulf %43, %45 : vector<8x128xf32>
    %47 = arith.addf %41, %46 : vector<8x128xf32>
    %48 = arith.mulf %0, %47 : vector<8x128xf32>
    %cst_16 = arith.constant dense<0.000000e+00> : vector<128xf32>
    %49 = vector.multi_reduction <add>, %48, %cst_16 [0] : vector<8x128xf32> to vector<128xf32>
    %50 = vector.shape_cast %49 : vector<128xf32> to vector<1x128xf32>
    %cst_17 = arith.constant 0.000000e+00 : f32
    %51 = vector.broadcast %cst_17 : f32 to vector<1x128xf32>
    %c0_i32 = arith.constant 0 : i32
    %52:5 = scf.while (%arg5 = %c0_i32, %arg6 = %0, %arg7 = %47, %arg8 = %50, %arg9 = %51) : (i32, vector<8x128xf32>, vector<8x128xf32>, vector<1x128xf32>, vector<1x128xf32>) -> (i32, vector<8x128xf32>, vector<8x128xf32>, vector<1x128xf32>, vector<1x128xf32>) {
      %c256_i32 = arith.constant 256 : i32
      %64 = arith.cmpi slt, %arg5, %c256_i32 : i32
      %65 = vector.shape_cast %arg9 : vector<1x128xf32> to vector<1x1x128xf32>
      %cst_25 = arith.constant dense<0x7F800000> : vector<1xf32>
      %66 = vector.multi_reduction <minimumf>, %65, %cst_25 [1, 2] : vector<1x1x128xf32> to vector<1xf32>
      %67 = vector.shape_cast %66 : vector<1xf32> to vector<1x1x1xf32>
      %68 = vector.extract %67[0, 0, 0] : f32 from vector<1x1x1xf32>
      %cst_26 = arith.constant 5.000000e-01 : f32
      %69 = arith.cmpf olt, %68, %cst_26 : f32
      %70 = arith.andi %64, %69 : i1
      scf.condition(%70) %arg5, %arg6, %arg7, %arg8, %arg9 : i32, vector<8x128xf32>, vector<8x128xf32>, vector<1x128xf32>, vector<1x128xf32>
    } do {
    ^bb0(%arg5: i32, %arg6: vector<8x128xf32>, %arg7: vector<8x128xf32>, %arg8: vector<1x128xf32>, %arg9: vector<1x128xf32>):
      %cst_25 = arith.constant 5.000000e-01 : f32
      %64 = vector.broadcast %cst_25 : f32 to vector<1x128xf32>
      %65 = arith.cmpf olt, %arg9, %64 : vector<1x128xf32>
      %66 = arith.mulf %arg7, %arg7 : vector<8x128xf32>
      %cst_26 = arith.constant dense<0.000000e+00> : vector<128xf32>
      %67 = vector.multi_reduction <add>, %66, %cst_26 [0] : vector<8x128xf32> to vector<128xf32>
      %68 = vector.shape_cast %67 : vector<128xf32> to vector<1x128xf32>
      %69 = math.rsqrt %68 : vector<1x128xf32>
      %70 = vector.broadcast %69 : vector<1x128xf32> to vector<8x128xf32>
      %71 = arith.mulf %arg7, %70 : vector<8x128xf32>
      %c0_27 = arith.constant 0 : index
      %c0_28 = arith.constant 0 : index
      %c0_29 = arith.constant 0 : index
      %72 = vector.load %arg1[%c0_27, %c0_28, %c0_29] : memref<8x8x128xf32, #tpu.memory_space<vmem>>, vector<1x8x128xf32>
      %73 = vector.shape_cast %72 : vector<1x8x128xf32> to vector<8x128xf32>
      %74 = vector.extract_strided_slice %71 {offsets = [0, 0], sizes = [1, 128], strides = [1, 1]} : vector<8x128xf32> to vector<1x128xf32>
      %75 = vector.broadcast %74 : vector<1x128xf32> to vector<8x128xf32>
      %76 = arith.mulf %73, %75 : vector<8x128xf32>
      %c1_30 = arith.constant 1 : index
      %c0_31 = arith.constant 0 : index
      %c0_32 = arith.constant 0 : index
      %77 = vector.load %arg1[%c1_30, %c0_31, %c0_32] : memref<8x8x128xf32, #tpu.memory_space<vmem>>, vector<1x8x128xf32>
      %78 = vector.shape_cast %77 : vector<1x8x128xf32> to vector<8x128xf32>
      %79 = vector.extract_strided_slice %71 {offsets = [1, 0], sizes = [1, 128], strides = [1, 1]} : vector<8x128xf32> to vector<1x128xf32>
      %80 = vector.broadcast %79 : vector<1x128xf32> to vector<8x128xf32>
      %81 = arith.mulf %78, %80 : vector<8x128xf32>
      %82 = arith.addf %76, %81 : vector<8x128xf32>
      %c2_33 = arith.constant 2 : index
      %c0_34 = arith.constant 0 : index
      %c0_35 = arith.constant 0 : index
      %83 = vector.load %arg1[%c2_33, %c0_34, %c0_35] : memref<8x8x128xf32, #tpu.memory_space<vmem>>, vector<1x8x128xf32>
      %84 = vector.shape_cast %83 : vector<1x8x128xf32> to vector<8x128xf32>
      %85 = vector.extract_strided_slice %71 {offsets = [2, 0], sizes = [1, 128], strides = [1, 1]} : vector<8x128xf32> to vector<1x128xf32>
      %86 = vector.broadcast %85 : vector<1x128xf32> to vector<8x128xf32>
      %87 = arith.mulf %84, %86 : vector<8x128xf32>
      %88 = arith.addf %82, %87 : vector<8x128xf32>
      %c3_36 = arith.constant 3 : index
      %c0_37 = arith.constant 0 : index
      %c0_38 = arith.constant 0 : index
      %89 = vector.load %arg1[%c3_36, %c0_37, %c0_38] : memref<8x8x128xf32, #tpu.memory_space<vmem>>, vector<1x8x128xf32>
      %90 = vector.shape_cast %89 : vector<1x8x128xf32> to vector<8x128xf32>
      %91 = vector.extract_strided_slice %71 {offsets = [3, 0], sizes = [1, 128], strides = [1, 1]} : vector<8x128xf32> to vector<1x128xf32>
      %92 = vector.broadcast %91 : vector<1x128xf32> to vector<8x128xf32>
      %93 = arith.mulf %90, %92 : vector<8x128xf32>
      %94 = arith.addf %88, %93 : vector<8x128xf32>
      %c4_39 = arith.constant 4 : index
      %c0_40 = arith.constant 0 : index
      %c0_41 = arith.constant 0 : index
      %95 = vector.load %arg1[%c4_39, %c0_40, %c0_41] : memref<8x8x128xf32, #tpu.memory_space<vmem>>, vector<1x8x128xf32>
      %96 = vector.shape_cast %95 : vector<1x8x128xf32> to vector<8x128xf32>
      %97 = vector.extract_strided_slice %71 {offsets = [4, 0], sizes = [1, 128], strides = [1, 1]} : vector<8x128xf32> to vector<1x128xf32>
      %98 = vector.broadcast %97 : vector<1x128xf32> to vector<8x128xf32>
      %99 = arith.mulf %96, %98 : vector<8x128xf32>
      %100 = arith.addf %94, %99 : vector<8x128xf32>
      %c5_42 = arith.constant 5 : index
      %c0_43 = arith.constant 0 : index
      %c0_44 = arith.constant 0 : index
      %101 = vector.load %arg1[%c5_42, %c0_43, %c0_44] : memref<8x8x128xf32, #tpu.memory_space<vmem>>, vector<1x8x128xf32>
      %102 = vector.shape_cast %101 : vector<1x8x128xf32> to vector<8x128xf32>
      %103 = vector.extract_strided_slice %71 {offsets = [5, 0], sizes = [1, 128], strides = [1, 1]} : vector<8x128xf32> to vector<1x128xf32>
      %104 = vector.broadcast %103 : vector<1x128xf32> to vector<8x128xf32>
      %105 = arith.mulf %102, %104 : vector<8x128xf32>
      %106 = arith.addf %100, %105 : vector<8x128xf32>
      %c6_45 = arith.constant 6 : index
      %c0_46 = arith.constant 0 : index
      %c0_47 = arith.constant 0 : index
      %107 = vector.load %arg1[%c6_45, %c0_46, %c0_47] : memref<8x8x128xf32, #tpu.memory_space<vmem>>, vector<1x8x128xf32>
      %108 = vector.shape_cast %107 : vector<1x8x128xf32> to vector<8x128xf32>
      %109 = vector.extract_strided_slice %71 {offsets = [6, 0], sizes = [1, 128], strides = [1, 1]} : vector<8x128xf32> to vector<1x128xf32>
      %110 = vector.broadcast %109 : vector<1x128xf32> to vector<8x128xf32>
      %111 = arith.mulf %108, %110 : vector<8x128xf32>
      %112 = arith.addf %106, %111 : vector<8x128xf32>
      %c7_48 = arith.constant 7 : index
      %c0_49 = arith.constant 0 : index
      %c0_50 = arith.constant 0 : index
      %113 = vector.load %arg1[%c7_48, %c0_49, %c0_50] : memref<8x8x128xf32, #tpu.memory_space<vmem>>, vector<1x8x128xf32>
      %114 = vector.shape_cast %113 : vector<1x8x128xf32> to vector<8x128xf32>
      %115 = vector.extract_strided_slice %71 {offsets = [7, 0], sizes = [1, 128], strides = [1, 1]} : vector<8x128xf32> to vector<1x128xf32>
      %116 = vector.broadcast %115 : vector<1x128xf32> to vector<8x128xf32>
      %117 = arith.mulf %114, %116 : vector<8x128xf32>
      %118 = arith.addf %112, %117 : vector<8x128xf32>
      %119 = arith.mulf %71, %118 : vector<8x128xf32>
      %cst_51 = arith.constant dense<0.000000e+00> : vector<128xf32>
      %120 = vector.multi_reduction <add>, %119, %cst_51 [0] : vector<8x128xf32> to vector<128xf32>
      %121 = vector.shape_cast %120 : vector<128xf32> to vector<1x128xf32>
      %122 = arith.subf %arg8, %121 : vector<1x128xf32>
      %123 = math.absf %122 : vector<1x128xf32>
      %cst_52 = arith.constant 1.000000e-03 : f32
      %124 = vector.broadcast %cst_52 : f32 to vector<1x128xf32>
      %125 = arith.cmpf olt, %123, %124 : vector<1x128xf32>
      %126 = vector.shape_cast %65 : vector<1x128xi1> to vector<1x128xi1>
      %127 = vector.broadcast %126 : vector<1x128xi1> to vector<8x128xi1>
      %128 = arith.select %127, %71, %arg6 : vector<8x128xi1>, vector<8x128xf32>
      %129 = vector.shape_cast %65 : vector<1x128xi1> to vector<1x128xi1>
      %130 = vector.broadcast %129 : vector<1x128xi1> to vector<8x128xi1>
      %131 = arith.select %130, %118, %arg7 : vector<8x128xi1>, vector<8x128xf32>
      %132 = arith.select %65, %121, %arg8 : vector<1x128xi1>, vector<1x128xf32>
      %133 = arith.extui %125 : vector<1x128xi1> to vector<1x128xi32>
      %134 = arith.sitofp %133 : vector<1x128xi32> to vector<1x128xf32>
      %135 = arith.maximumf %arg9, %134 : vector<1x128xf32>
      %c1_i32 = arith.constant 1 : i32
      %136 = arith.addi %arg5, %c1_i32 : i32
      scf.yield %136, %128, %131, %132, %135 : i32, vector<8x128xf32>, vector<8x128xf32>, vector<1x128xf32>, vector<1x128xf32>
    }
    %c0_18 = arith.constant 0 : index
    %c0_19 = arith.constant 0 : index
    %53 = vector.load %arg2[%c0_18, %c0_19] : memref<8x128xf32, #tpu.memory_space<vmem>>, vector<8x128xf32>
    %54 = arith.mulf %52#1, %53 : vector<8x128xf32>
    %cst_20 = arith.constant dense<0.000000e+00> : vector<128xf32>
    %55 = vector.multi_reduction <add>, %54, %cst_20 [0] : vector<8x128xf32> to vector<128xf32>
    %56 = vector.shape_cast %55 : vector<128xf32> to vector<1x128xf32>
    %57 = tpu.reciprocal %56 {approx = true} : vector<1x128xf32> -> vector<1x128xf32>
    %58 = vector.broadcast %57 : vector<1x128xf32> to vector<8x128xf32>
    %59 = arith.mulf %52#1, %58 : vector<8x128xf32>
    %c0_21 = arith.constant 0 : index
    %c0_22 = arith.constant 0 : index
    %60 = vector.load %arg3[%c0_21, %c0_22] : memref<1x128xf32, #tpu.memory_space<vmem>>, vector<1x128xf32>
    %61 = vector.broadcast %60 : vector<1x128xf32> to vector<8x128xf32>
    %62 = arith.mulf %59, %61 : vector<8x128xf32>
    %c0_23 = arith.constant 0 : index
    %c0_24 = arith.constant 0 : index
    %63 = vector.load %arg4[%c0_23, %c0_24] : memref<8x128xf32, #tpu.memory_space<vmem>>, vector<8x128xf32>
    tpu.vector_store %arg4[%c0_23, %c0_24], %62 {strides = array<i32>} : memref<8x128xf32, #tpu.memory_space<vmem>>, vector<8x128xf32>,
    return
  }
  func.func @transform_0(%arg0: i32) -> (i32, i32, i32) {
    %c0_i32 = arith.constant 0 : i32
    %c0_i32_0 = arith.constant 0 : i32
    %c0_i32_1 = arith.constant 0 : i32
    %c0_i32_2 = arith.constant 0 : i32
    return %c0_i32, %c0_i32_0, %c0_i32_1 : i32, i32, i32
  }
  func.func @transform_1(%arg0: i32) -> (i32, i32) {
    %c0_i32 = arith.constant 0 : i32
    %c0_i32_0 = arith.constant 0 : i32
    %c0_i32_1 = arith.constant 0 : i32
    return %c0_i32, %c0_i32_0 : i32, i32
  }
  func.func @transform_2(%arg0: i32) -> (i32, i32) {
    %c0_i32 = arith.constant 0 : i32
    %c0_i32_0 = arith.constant 0 : i32
    %c0_i32_1 = arith.constant 0 : i32
    return %c0_i32, %c0_i32_0 : i32, i32
  }
  func.func @transform_3(%arg0: i32) -> (i32, i32) {
    %c0_i32 = arith.constant 0 : i32
    %c0_i32_0 = arith.constant 0 : i32
    %c0_i32_1 = arith.constant 0 : i32
    return %c0_i32, %c0_i32_0 : i32, i32
  }
}

</mosaic_0001>

<bundles_post_ra>
// kernel: tpu_custom_call.1
= control target key start
LH: loop header
LB: loop body
LE: loop exit
PB: predicated region body
PF: predicated region fallthrough
CT: control target
= control target key end

     0   :  { %8 = vsyncpa [#allocation3], 0  ;;  %s537_s0 = inlined_call_operand.hbm [shape: f32[8,8,128], index: 0, kind: input, shape index: {}]   ;;  %s538_s1 = inlined_call_operand.hbm [shape: f32[8,128], index: 1, kind: input, shape index: {}]   ;;  %s539_s2 = inlined_call_operand.vmem [shape: f32[1,128], index: 2, kind: input, shape index: {}]   ;;  %s540_s3 = inlined_call_operand.hbm [shape: f32[8,128], index: 3, kind: output, shape index: {}]  }
   0x1   :  { %9 = vsyncpa [#allocation6], 0 }
   0x2   :  { %10 = vsyncpa [#allocation4], 0  ;;  %s420_s12 = smov [#allocation2]   ;;  %s300_s16 = scalar_lea.hbm %s537_s0, 1024 }
   0x3   :  { %s16_s13 = sshll.u32 %s420_s12, 4  ;;  %p301_p0 = scmp.ne.s32.totalorder %s537_s0, %s300_s16  ;;  %s17_s13 = int_to_ptr.vmem [resolvable:$true] %s16_s13 }
   0x4   :  { %p304_p1 = scmp.lt.u32.totalorder %s300_s16, %s537_s0 }
   0x6   :  { %p306_p2 = pnand %p304_p1, %p301_p0 }
   0x8   :  { %309 = shalt.err (!%p306_p2)
}
   0x9   :  { %s310_s21 = scalar_lea.vmem %s17_s13, 1024  ;;  %p315_p4 = scmp.lt.s32.totalorder %s17_s13, %s17_s13 }
   0xa   :  { %p311_p3 = scmp.ne.s32.totalorder %s17_s13, %s310_s21  ;;  %p316_p5 = scmp.lt.s32.totalorder %s310_s21, %s310_s21 }
   0xc   :  { %p317_p6 = por %p316_p5, %p315_p4 }
   0xe   :  { %p318_p7 = pnand %p317_p6, %p311_p3 }
  0x10   :  { %321 = shalt.err (!%p318_p7)
}
  0x11   :  { %s421_s22 = smov 128   ;;  %s422_s23 = smov 8  }
  0x12   :  { %22 = dma.hbm_to_vmem [thread:$0]  %s537_s0, 1024, %s17_s13, [#allocation3], %s421_s22, %s421_s22, %s422_s23  }
  0x13   :  { %s423_s26 = smov [#allocation5]   ;;  %s322_s30 = scalar_lea.hbm %s538_s1, 128 }
  0x14   :  { %s29_s27 = sshll.u32 %s423_s26, 4  ;;  %p323_p8 = scmp.ne.s32.totalorder %s538_s1, %s322_s30  ;;  %s30_s27 = int_to_ptr.vmem [resolvable:$true] %s29_s27 }
  0x15   :  { %p326_p9 = scmp.lt.u32.totalorder %s322_s30, %s538_s1 }
  0x17   :  { %p328_p10 = pnand %p326_p9, %p323_p8 }
  0x19   :  { %331 = shalt.err (!%p328_p10)
}
  0x1a   :  { %s332_s8 = scalar_lea.vmem %s30_s27, 128  ;;  %p337_p12 = scmp.lt.s32.totalorder %s30_s27, %s30_s27 }
  0x1b   :  { %p333_p11 = scmp.ne.s32.totalorder %s30_s27, %s332_s8  ;;  %p338_p13 = scmp.lt.s32.totalorder %s332_s8, %s332_s8 }
  0x1d   :  { %p339_p0 = por %p338_p13, %p337_p12 }
  0x1f   :  { %p340_p1 = pnand %p339_p0, %p333_p11 }
  0x21   :  { %343 = shalt.err (!%p340_p1)
}
  0x22   :  { %32 = dma.hbm_to_vmem [thread:$0]  %s538_s1, 128, %s30_s27, [#allocation6]  }
  0x23   :  { %390 = dma.done.wait [#allocation3], 1024  }
  0x24   :  { %391 = vsyncadd [#allocation3], 4294966272 }
  0x25   :  { %392 = dma.done.wait [#allocation6], 128  }
  0x26   :  { %393 = vsyncadd [#allocation6], 4294967168  ;;  %v41_v0 = vld [vmem:[#allocation2] sm:$0xff]  ;;  %v44_v1 = vld [vmem:[#allocation2 + $0x8] sm:$0xff]  ;;  %v424_v30 = vmov 0.0  }
  0x27   :  { %v48_v2 = vld [vmem:[#allocation2 + $0x10] sm:$0xff]  ;;  %v42_v3 = vmul.f32 0.35355338, %v41_v0  ;;  %v45_v4 = vmul.f32 0.35355338, %v44_v1  ;;  %v52_v6 = vld [vmem:[#allocation2 + $0x18] sm:$0xff]  ;;  %218 = vmin.xlane.f32.xlu0 %v424_v30 }
  0x28   :  { %v49_v5 = vmul.f32 0.35355338, %v48_v2  ;;  %v56_v7 = vld [vmem:[#allocation2 + $0x20] sm:$0xff]  ;;  %v53_v9 = vmul.f32 0.35355338, %v52_v6  ;;  %v60_v10 = vld [vmem:[#allocation2 + $0x28] sm:$0xff] }
  0x29   :  { %v46_v8 = vadd.f32 %v45_v4, %v42_v3  ;;  %v57_v12 = vmul.f32 0.35355338, %v56_v7  ;;  %v64_v13 = vld [vmem:[#allocation2 + $0x30] sm:$0xff]  ;;  %v61_v15 = vmul.f32 0.35355338, %v60_v10  ;;  %v68_v16 = vld [vmem:[#allocation2 + $0x38] sm:$0xff] }
  0x2a   :  { %v65_v18 = vmul.f32 0.35355338, %v64_v13  ;;  %v69_v20 = vmul.f32 0.35355338, %v68_v16  ;;  %v471_v32 = vmov 0.35355338  }
  0x2b   :  { %v50_v11 = vadd.f32 %v49_v5, %v46_v8 }
  0x2d   :  { %v54_v14 = vadd.f32 %v53_v9, %v50_v11 }
  0x2f   :  { %v58_v17 = vadd.f32 %v57_v12, %v54_v14 }
  0x31   :  { %v62_v19 = vadd.f32 %v61_v15, %v58_v17 }
  0x33   :  { %v66_v21 = vadd.f32 %v65_v18, %v62_v19 }
  0x35   :  { %v70_v22 = vadd.f32 %v69_v20, %v66_v21  }
  0x37   :  { %v71_v23 = vmul.f32 0.35355338, %v70_v22 }
  0x39   :  { %v72_v24 = vrot.slane %v71_v23, 4 }
  0x3b   :  { %v73_v25 = vadd.f32 %v72_v24, %v71_v23 }
  0x3d   :  { %v74_v26 = vrot.slane %v73_v25, 2 }
  0x3f   :  { %v75_v27 = vadd.f32 %v74_v26, %v73_v25 }
  0x41   :  { %v76_v28 = vrot.slane %v75_v27, 1 }
  0x43   :  { %v77_v29 = vadd.f32 %v76_v28, %v75_v27  }
  0xb4   :  { %v219_v31 = vpop.xlane.xlu0 %218 }
  0xb5   :  { %237 = vpush %v219_v31 }
  0xe6   :  { %s238_s1 = spop %237 }
  0xe7   :  { %p221_p2 = scmp.lt.f32.partialorder %s238_s1, 0.5 }
  0xe8   :  { %v473_v33 = vmov (%p221_p2), 0.0   ;;  %v479_v34 = vmov (%p221_p2), 0.35355338   ;;  %s481_s10 = smov (%p221_p2), 0  }
  0xe9   :  { %223 = sbr.rel (!%p221_p2) target bundleno = 510 (0x1fe), region = 48 }
  0xf0 LB: > { %v94_v35 = vmul.f32 %v406_v22, %v406_v22  ;;  %s176_s11 = sadd.s32 1, %s414_s10   ;;  %v104_v42 = vlaneseq  ;;  %v103_v51 = vld [vmem:[#allocation2] sm:$0xff]  ;;  %v109_v52 = vld [vmem:[#allocation2 + $0x8] sm:$0xff]  ;;  %v116_v53 = vld [vmem:[#allocation2 + $0x10] sm:$0xff]  ;;  %vm93_vm0 = vcmp.lt.f32.partialorder %v398_v33, 0.5  ;;  %s414_s10 = sphi %s481_s10, %s542_s10   ;;  %v410_v34 = vphi %v479_v34, %v541_v34   ;;  %v406_v22 = vphi %v70_v22, %v171_v22   ;;  %v402_v29 = vphi %v77_v29, %v172_v29   ;;  %v398_v33 = vphi %v473_v33, %v175_v33  }
  0xf1   : > { %v123_v59 = vld [vmem:[#allocation2 + $0x18] sm:$0xff]  ;;  %v130_v1 = vld [vmem:[#allocation2 + $0x20] sm:$0xff]  ;;  %v137_v7 = vld [vmem:[#allocation2 + $0x28] sm:$0xff]  ;;  %p84_p3 = scmp.lt.s32.totalorder %s176_s11, 256  ;;  %s542_s10 = smov %s176_s11 }
  0xf2   : > { %v95_v36 = vrot.slane %v94_v35, 4  ;;  %v105_v43 = vshrl.u32 %v104_v42, 7  ;;  %v144_v11 = vld [vmem:[#allocation2 + $0x30] sm:$0xff]  ;;  %v151_v15 = vld [vmem:[#allocation2 + $0x38] sm:$0xff] }
  0xf4   : > { %v96_v37 = vadd.f32 %v95_v36, %v94_v35  ;;  %v106_v44 = vsub.s32 0, %v105_v43  ;;  %v112_v45 = vsub.s32 1, %v105_v43  ;;  %v119_v46 = vsub.s32 2, %v105_v43 }
  0xf5   : > { %v126_v47 = vsub.s32 3, %v105_v43  ;;  %v133_v50 = vsub.s32 4, %v105_v43  ;;  %v140_v54 = vsub.s32 5, %v105_v43  ;;  %v147_v60 = vsub.s32 6, %v105_v43 }
  0xf6   : > { %v97_v38 = vrot.slane %v96_v37, 2  ;;  %v154_v2 = vsub.s32 7, %v105_v43 }
  0xf8   : > { %v98_v39 = vadd.f32 %v97_v38, %v96_v37 }
  0xfa   : > { %v99_v40 = vrot.slane %v98_v39, 1 }
  0xfc   : > { %v100_v41 = vadd.f32 %v99_v40, %v98_v39 }
  0xfe   : > { %296 = vrsqrt.f32 %v100_v41 }
 0x108   : > { %v297_v48 = vpop.eup %296 }
 0x109   : > { %v102_v49 = vmul.f32 %v406_v22, %v297_v48 }
 0x10b   : > { %v107_v55 = vrot.slane %v102_v49, %v106_v44  ;;  %v113_v56 = vrot.slane %v102_v49, %v112_v45  ;;  %v120_v57 = vrot.slane %v102_v49, %v119_v46  ;;  %v127_v58 = vrot.slane %v102_v49, %v126_v47 }
 0x10c   : > { %v134_v0 = vrot.slane %v102_v49, %v133_v50  ;;  %v141_v5 = vrot.slane %v102_v49, %v140_v54  ;;  %v170_v6 = vsel %vm93_vm0, %v102_v49, %v410_v34   ;;  %v148_v10 = vrot.slane %v102_v49, %v147_v60 }
 0x10d   : > { %v108_v61 = vmul.f32 %v107_v55, %v103_v51  ;;  %v114_v62 = vmul.f32 %v113_v56, %v109_v52  ;;  %v121_v63 = vmul.f32 %v120_v57, %v116_v53  ;;  %v128_v4 = vmul.f32 %v127_v58, %v123_v59 }
 0x10e   : > { %v135_v9 = vmul.f32 %v134_v0, %v130_v1  ;;  %v142_v13 = vmul.f32 %v141_v5, %v137_v7  ;;  %v155_v14 = vrot.slane %v102_v49, %v154_v2  ;;  %v149_v17 = vmul.f32 %v148_v10, %v144_v11 }
 0x10f   : > { %v115_v3 = vadd.f32 %v114_v62, %v108_v61  ;;  %v425_v34 = vmov 0.0  }
 0x110   : > { %v156_v19 = vmul.f32 %v155_v14, %v151_v15 }
 0x111   : > { %v122_v8 = vadd.f32 %v121_v63, %v115_v3 }
 0x113   : > { %v129_v12 = vadd.f32 %v128_v4, %v122_v8 }
 0x115   : > { %v136_v16 = vadd.f32 %v135_v9, %v129_v12 }
 0x117   : > { %v143_v18 = vadd.f32 %v142_v13, %v136_v16 }
 0x119   : > { %v150_v20 = vadd.f32 %v149_v17, %v143_v18 }
 0x11b   : > { %v157_v21 = vadd.f32 %v156_v19, %v150_v20 }
 0x11d   : > { %v158_v23 = vmul.f32 %v157_v21, %v102_v49  ;;  %v171_v22 = vsel %vm93_vm0, %v157_v21, %v406_v22  }
 0x11f   : > { %v159_v24 = vrot.slane %v158_v23, 4 }
 0x121   : > { %v160_v25 = vadd.f32 %v159_v24, %v158_v23 }
 0x123   : > { %v161_v26 = vrot.slane %v160_v25, 2 }
 0x125   : > { %v162_v27 = vadd.f32 %v161_v26, %v160_v25 }
 0x127   : > { %v163_v28 = vrot.slane %v162_v27, 1 }
 0x129   : > { %v164_v30 = vadd.f32 %v163_v28, %v162_v27 }
 0x12b   : > { %v165_v31 = vsub.f32 %v402_v29, %v164_v30  ;;  %v172_v29 = vsel %vm93_vm0, %v164_v30, %v402_v29  }
 0x12d   : > { %v166_v32 = vand.u32 2147483647, %v165_v31 }
 0x12f   : > { %vm167_vm1 = vcmp.lt.f32.partialorder %v166_v32, 0.001 }
 0x130   : > { %v235_v35 = vsel %vm167_vm1, 1.0, %v425_v34  ;;  %v541_v34 = vmov %v170_v6 }
 0x131   : > { %v175_v33 = vmax.f32 %v398_v33, %v235_v35  }
 0x133   : > { %85 = vmin.xlane.f32.xlu0 %v175_v33 }
 0x1c0   : > { %v86_v36 = vpop.xlane.xlu0 %85 }
 0x1c1   : > { %239 = vpush %v86_v36 }
 0x1f2   : > { %s240_s12 = spop %239 }
 0x1f3   : > { %p88_p4 = scmp.lt.f32.partialorder %s240_s12, 0.5 }
 0x1f5   : > { %p89_p5 = pnand %p88_p4, %p84_p3 }
 0x1f6   :  { %v543_v32 = vmov (%p89_p5), %v170_v6 }
 0x1f7   :  { %92 = sbr.rel (!%p89_p5) target bundleno = 240 (0xf0), region = 54 }
 0x1fe PF:  { %v177_v37 = vld [vmem:[#allocation5] sm:$0xff]  ;;  %s426_s15 = smov [#allocation7]   ;;  %v418_v32 = vphi %v471_v32, %v543_v32  }
 0x1ff   :  { %v178_v38 = vmul.f32 %v418_v32, %v177_v37  ;;  %v236_v46 = vld [vmem:[%s539_s2] ss:$0 sm:$0xff]  ;;  %s202_s16 = sshll.u32 %s426_s15, 4  ;;  %s203_s16 = int_to_ptr.vmem [resolvable:$true] %s202_s16 }
 0x200   :  { %s344_s17 = scalar_lea.vmem %s203_s16, 128  ;;  %p349_p7 = scmp.lt.s32.totalorder %s203_s16, %s203_s16 }
 0x201   :  { %v179_v39 = vrot.slane %v178_v38, 4  ;;  %p345_p6 = scmp.ne.s32.totalorder %s203_s16, %s344_s17  ;;  %p350_p8 = scmp.lt.s32.totalorder %s344_s17, %s344_s17 }
 0x203   :  { %v180_v40 = vadd.f32 %v179_v39, %v178_v38  ;;  %p351_p9 = por %p350_p8, %p349_p7 }
 0x205   :  { %v181_v41 = vrot.slane %v180_v40, 2  ;;  %p352_p10 = pnand %p351_p9, %p345_p6 }
 0x207   :  { %v182_v42 = vadd.f32 %v181_v41, %v180_v40 }
 0x209   :  { %v183_v43 = vrot.slane %v182_v42, 1 }
 0x20b   :  { %v184_v44 = vadd.f32 %v183_v43, %v182_v42 }
 0x20d   :  { %298 = vrcp.f32 %v184_v44 }
 0x217   :  { %v299_v45 = vpop.eup %298 }
 0x218   :  { %v186_v22 = vmul.f32 %v418_v32, %v299_v45 }
 0x21a   :  { %v194_v29 = vmul.f32 %v236_v46, %v186_v22 }
 0x21c   :  { %195 = vst [vmem:[#allocation7] sm:$0xff] %v194_v29 }
 0x21d   :  { %355 = shalt.err (!%p352_p10)
}
 0x21e   :  { %s356_s20 = scalar_lea.hbm %s540_s3, 128 }
 0x21f   :  { %p357_p11 = scmp.ne.s32.totalorder %s540_s3, %s356_s20  ;;  %p360_p12 = scmp.lt.u32.totalorder %s356_s20, %s540_s3 }
 0x221   :  { %p362_p13 = pnand %p360_p12, %p357_p11 }
 0x223   :  { %365 = shalt.err (!%p362_p13)
}
 0x224   :  { %205 = dma.vmem_to_hbm [thread:$0]  %s203_s16, 128, %s540_s3, [#allocation4]  }
 0x225   :  { %394 = dma.done.wait [#allocation4], 128  }
 0x226   :  { %395 = vsyncadd [#allocation4], 4294967168 }
 0x227   :  { %209 = vsyncpa [#allocation3], 1 }
 0x228   :  { %210 = vsyncpa [#allocation6], 1 }
 0x229   :  { %211 = vsyncpa [#allocation4], 1 }

</bundles_post_ra>
